<compile_context>
chip_gen: v5e
topology: v5e:2x2
jax: 0.10.0
libtpu: 0.0.40
codegen_flags: <defaults>
</compile_context>

<pallas_src>
import functools

import jax
import jax.numpy as jnp
from jax.experimental import pallas as pl
from jax.experimental.pallas import tpu as pltpu


def _soft_q_kernel(state_ref, action_ref, w1s_ref, w1a_ref, b1_ref,
                   w2_ref, b2_ref, w3_ref, b3_ref, o_ref):
    # state_ref: [TB, num_inputs]     w1s_ref: [num_inputs, H]
    # action_ref:[TB, num_actions]    w1a_ref: [num_actions, H]
    # b1_ref/b2_ref: [1, H]           w2_ref: [H, H]
    # w3_ref: [1, H]                  b3_ref: [1, 1]  (SMEM scalar)
    # o_ref: [TB, 1]

    # linear1 (concat folded into two MXU dots) + relu
    h1 = (jnp.dot(state_ref[...], w1s_ref[...], preferred_element_type=jnp.float32)
          + jnp.dot(action_ref[...], w1a_ref[...], preferred_element_type=jnp.float32)
          + b1_ref[...])
    h1 = jnp.maximum(h1, 0.0)

    # linear2 + relu
    h2 = jnp.dot(h1, w2_ref[...], preferred_element_type=jnp.float32) + b2_ref[...]
    h2 = jnp.maximum(h2, 0.0)

    # linear3: broadcast-mul + cross-lane reduce (runs on VPU/XLU slots,
    # overlaps with MXU work instead of wasting a near-empty MXU pass).
    q = jnp.sum(h2 * w3_ref[...], axis=-1, keepdims=True) + b3_ref[0, 0]
    o_ref[...] = q.astype(o_ref.dtype)


@functools.partial(jax.jit, static_argnames=("block_b",))
def soft_q_forward(state, action, params, *, block_b=512):
    """state: [B, num_inputs], action: [B, num_actions] -> q: [B, 1]."""
    w1, b1, w2, b2, w3, b3 = params
    B, n_in = state.shape
    n_act = action.shape[1]
    H = w1.shape[0]

    # Host-side layout plumbing (free under jit; removes all in-kernel
    # transposes and the wrapper-side concat).
    w1s_t = w1[:, :n_in].T           # [num_inputs, H]
    w1a_t = w1[:, n_in:].T           # [num_actions, H]
    w2_t = w2.T                      # [H, H]
    w3_row = w3.reshape(1, H)        # [1, H]
    b1_2d = b1.reshape(1, H)
    b2_2d = b2.reshape(1, H)
    b3_2d = b3.reshape(1, 1)         # scalar -> SMEM

    # Batch tiling: one resident tile for small batches, otherwise stream
    # block_b-row tiles (keeps VMEM use generation-independent, incl. v7x).
    tb = B if B <= block_b else block_b
    grid = (pl.cdiv(B, tb),)

    batch_spec = lambda cols: pl.BlockSpec((tb, cols), lambda i: (i, 0))
    resident = lambda shape: pl.BlockSpec(shape, lambda i: tuple(0 for _ in shape))

    return pl.pallas_call(
        _soft_q_kernel,
        out_shape=jax.ShapeDtypeStruct((B, 1), jnp.float32),
        grid=grid,
        in_specs=[
            batch_spec(n_in),                                   # state tile
            batch_spec(n_act),                                  # action tile
            resident(w1s_t.shape),                              # W1 (state part)
            resident(w1a_t.shape),                              # W1 (action part)
            resident(b1_2d.shape),                              # b1
            resident(w2_t.shape),                               # W2
            resident(b2_2d.shape),                              # b2
            resident(w3_row.shape),                             # W3 row
            pl.BlockSpec(memory_space=pltpu.MemorySpace.SMEM),  # b3 scalar
        ],
        out_specs=pl.BlockSpec((tb, 1), lambda i: (i, 0)),
        compiler_params=pltpu.CompilerParams(
            dimension_semantics=("parallel",)),
    )(state, action, w1s_t, w1a_t, b1_2d, w2_t, b2_2d, w3_row, b3_2d)


def init_params(key, num_inputs, num_actions, hidden_size, init_w=0.003):
    """Mimics PyTorch defaults + uniform(-init_w, init_w) on the last layer."""
    D = num_inputs + num_actions
    ks = jax.random.split(key, 6)

    def torch_default(kw, kb, fan_in, out_f, in_f):
        bound = 1.0 / jnp.sqrt(jnp.float32(fan_in))
        w = jax.random.uniform(kw, (out_f, in_f), jnp.float32, -bound, bound)
        b = jax.random.uniform(kb, (out_f,), jnp.float32, -bound, bound)
        return w, b

    w1, b1 = torch_default(ks[0], ks[1], D, hidden_size, D)
    w2, b2 = torch_default(ks[2], ks[3], hidden_size, hidden_size, hidden_size)
    w3 = jax.random.uniform(ks[4], (1, hidden_size), jnp.float32, -init_w, init_w)
    b3 = jax.random.uniform(ks[5], (1,), jnp.float32, -init_w, init_w)
    return (w1, b1, w2, b2, w3, b3)


def reference_forward(state, action, params):
    """Pure-JAX reference matching the PyTorch module exactly."""
    w1, b1, w2, b2, w3, b3 = params
    x = jnp.concatenate([state, action], axis=1)
    h1 = jnp.maximum(x @ w1.T + b1, 0.0)
    h2 = jnp.maximum(h1 @ w2.T + b2, 0.0)
    return h2 @ w3.T + b3


if __name__ == "__main__":
    num_inputs, num_actions, hidden_size = 16, 4, 32
    batch = 8

    key = jax.random.PRNGKey(0)
    k_state, k_action, k_params = jax.random.split(key, 3)

    state = jax.random.normal(k_state, (batch, num_inputs), jnp.float32)
    action = jax.random.normal(k_action, (batch, num_actions), jnp.float32)
    params = init_params(k_params, num_inputs, num_actions, hidden_size)

    q = soft_q_forward(state, action, params)
    q = jax.block_until_ready(q)

    q_ref = reference_forward(state, action, params)
    assert q.shape == (batch, 1), q.shape
    assert jnp.allclose(q, q_ref, atol=1e-5, rtol=1e-5), "mismatch vs reference"

    print("KERNEL_OK")
</pallas_src>

<mosaic_0001>
module attributes {stable_mosaic.version = 11 : i64} {
  func.func @_soft_q_kernel(%arg0: i32, %arg1: memref<8x16xf32, #tpu.memory_space<vmem>>, %arg2: memref<8x4xf32, #tpu.memory_space<vmem>>, %arg3: memref<16x32xf32, #tpu.memory_space<vmem>>, %arg4: memref<4x32xf32, #tpu.memory_space<vmem>>, %arg5: memref<1x32xf32, #tpu.memory_space<vmem>>, %arg6: memref<32x32xf32, #tpu.memory_space<vmem>>, %arg7: memref<1x32xf32, #tpu.memory_space<vmem>>, %arg8: memref<1x32xf32, #tpu.memory_space<vmem>>, %arg9: memref<1x1xf32, #tpu.memory_space<smem>>, %arg10: memref<8x1xf32, #tpu.memory_space<vmem>>) attributes {dimension_semantics = [#tpu.dimension_semantics<parallel>], iteration_bounds = array<i64: 1>, scalar_prefetch = 0 : i64, scratch_operands = 0 : i64, tpu.core_type = #tpu.core_type<tc>, window_params = [{transform_indices = @transform_0, window_bounds = array<i64: 8, 16>}, {transform_indices = @transform_1, window_bounds = array<i64: 8, 4>}, {pipeline_mode = #tpu.pipeline_mode<synchronous>, transform_indices = @transform_2, window_bounds = array<i64: 16, 32>}, {pipeline_mode = #tpu.pipeline_mode<synchronous>, transform_indices = @transform_3, window_bounds = array<i64: 4, 32>}, {pipeline_mode = #tpu.pipeline_mode<synchronous>, transform_indices = @transform_4, window_bounds = array<i64: 1, 32>}, {pipeline_mode = #tpu.pipeline_mode<synchronous>, transform_indices = @transform_5, window_bounds = array<i64: 32, 32>}, {pipeline_mode = #tpu.pipeline_mode<synchronous>, transform_indices = @transform_6, window_bounds = array<i64: 1, 32>}, {pipeline_mode = #tpu.pipeline_mode<synchronous>, transform_indices = @transform_7, window_bounds = array<i64: 1, 32>}, {transform_indices = @transform_8, window_bounds = array<i64: 1, 1>}, {transform_indices = @transform_9, window_bounds = array<i64: 8, 1>}]} {
    %c0 = arith.constant 0 : index
    %c0_0 = arith.constant 0 : index
    %0 = vector.load %arg1[%c0, %c0_0] : memref<8x16xf32, #tpu.memory_space<vmem>>, vector<8x16xf32>
    %c0_1 = arith.constant 0 : index
    %c0_2 = arith.constant 0 : index
    %1 = vector.load %arg3[%c0_1, %c0_2] : memref<16x32xf32, #tpu.memory_space<vmem>>, vector<16x32xf32>
    %cst = arith.constant dense<0.000000e+00> : vector<8x32xf32>
    %2 = tpu.matmul %0, %1, %cst {dimension_numbers = #tpu.dot_dimension_numbers<[1], [0], [0], [1], [0, 0, 1, 1], [], []>} : vector<8x16xf32>, vector<16x32xf32>, vector<8x32xf32> -> vector<8x32xf32>
    %c0_3 = arith.constant 0 : index
    %c0_4 = arith.constant 0 : index
    %3 = vector.load %arg2[%c0_3, %c0_4] : memref<8x4xf32, #tpu.memory_space<vmem>>, vector<8x4xf32>
    %c0_5 = arith.constant 0 : index
    %c0_6 = arith.constant 0 : index
    %4 = vector.load %arg4[%c0_5, %c0_6] : memref<4x32xf32, #tpu.memory_space<vmem>>, vector<4x32xf32>
    %cst_7 = arith.constant dense<0.000000e+00> : vector<8x32xf32>
    %5 = tpu.matmul %3, %4, %cst_7 {dimension_numbers = #tpu.dot_dimension_numbers<[1], [0], [0], [1], [0, 0, 1, 1], [], []>} : vector<8x4xf32>, vector<4x32xf32>, vector<8x32xf32> -> vector<8x32xf32>
    %6 = arith.addf %2, %5 : vector<8x32xf32>
    %c0_8 = arith.constant 0 : index
    %c0_9 = arith.constant 0 : index
    %7 = vector.load %arg5[%c0_8, %c0_9] : memref<1x32xf32, #tpu.memory_space<vmem>>, vector<1x32xf32>
    %8 = vector.broadcast %7 : vector<1x32xf32> to vector<8x32xf32>
    %9 = arith.addf %6, %8 : vector<8x32xf32>
    %cst_10 = arith.constant 0.000000e+00 : f32
    %10 = vector.broadcast %cst_10 : f32 to vector<8x32xf32>
    %11 = arith.maximumf %9, %10 : vector<8x32xf32>
    %c0_11 = arith.constant 0 : index
    %c0_12 = arith.constant 0 : index
    %12 = vector.load %arg6[%c0_11, %c0_12] : memref<32x32xf32, #tpu.memory_space<vmem>>, vector<32x32xf32>
    %cst_13 = arith.constant dense<0.000000e+00> : vector<8x32xf32>
    %13 = tpu.matmul %11, %12, %cst_13 {dimension_numbers = #tpu.dot_dimension_numbers<[1], [0], [0], [1], [0, 0, 1, 1], [], []>} : vector<8x32xf32>, vector<32x32xf32>, vector<8x32xf32> -> vector<8x32xf32>
    %c0_14 = arith.constant 0 : index
    %c0_15 = arith.constant 0 : index
    %14 = vector.load %arg7[%c0_14, %c0_15] : memref<1x32xf32, #tpu.memory_space<vmem>>, vector<1x32xf32>
    %15 = vector.broadcast %14 : vector<1x32xf32> to vector<8x32xf32>
    %16 = arith.addf %13, %15 : vector<8x32xf32>
    %cst_16 = arith.constant 0.000000e+00 : f32
    %17 = vector.broadcast %cst_16 : f32 to vector<8x32xf32>
    %18 = arith.maximumf %16, %17 : vector<8x32xf32>
    %c0_17 = arith.constant 0 : index
    %c0_18 = arith.constant 0 : index
    %19 = vector.load %arg8[%c0_17, %c0_18] : memref<1x32xf32, #tpu.memory_space<vmem>>, vector<1x32xf32>
    %20 = vector.broadcast %19 : vector<1x32xf32> to vector<8x32xf32>
    %21 = arith.mulf %18, %20 : vector<8x32xf32>
    %cst_19 = arith.constant dense<0.000000e+00> : vector<8xf32>
    %22 = vector.multi_reduction <add>, %21, %cst_19 [1] : vector<8x32xf32> to vector<8xf32>
    %23 = vector.shape_cast %22 : vector<8xf32> to vector<8x1xf32>
    %c0_20 = arith.constant 0 : index
    %c0_21 = arith.constant 0 : index
    %24 = memref.load %arg9[%c0_20, %c0_21] : memref<1x1xf32, #tpu.memory_space<smem>>
    %25 = vector.broadcast %24 : f32 to vector<8x1xf32>
    %26 = arith.addf %23, %25 : vector<8x1xf32>
    %c0_22 = arith.constant 0 : index
    %c0_23 = arith.constant 0 : index
    %27 = vector.load %arg10[%c0_22, %c0_23] : memref<8x1xf32, #tpu.memory_space<vmem>>, vector<8x1xf32>
    tpu.vector_store %arg10[%c0_22, %c0_23], %26 {strides = array<i32>} : memref<8x1xf32, #tpu.memory_space<vmem>>, vector<8x1xf32>,
    return
  }
  func.func @transform_0(%arg0: i32) -> (i32, i32) {
    %c0_i32 = arith.constant 0 : i32
    %c0_i32_0 = arith.constant 0 : i32
    return %arg0, %c0_i32 : i32, i32
  }
  func.func @transform_1(%arg0: i32) -> (i32, i32) {
    %c0_i32 = arith.constant 0 : i32
    %c0_i32_0 = arith.constant 0 : i32
    return %arg0, %c0_i32 : i32, i32
  }
  func.func @transform_2(%arg0: i32) -> (i32, i32) {
    %c0_i32 = arith.constant 0 : i32
    %c0_i32_0 = arith.constant 0 : i32
    %c0_i32_1 = arith.constant 0 : i32
    return %c0_i32, %c0_i32_0 : i32, i32
  }
  func.func @transform_3(%arg0: i32) -> (i32, i32) {
    %c0_i32 = arith.constant 0 : i32
    %c0_i32_0 = arith.constant 0 : i32
    %c0_i32_1 = arith.constant 0 : i32
    return %c0_i32, %c0_i32_0 : i32, i32
  }
  func.func @transform_4(%arg0: i32) -> (i32, i32) {
    %c0_i32 = arith.constant 0 : i32
    %c0_i32_0 = arith.constant 0 : i32
    %c0_i32_1 = arith.constant 0 : i32
    return %c0_i32, %c0_i32_0 : i32, i32
  }
  func.func @transform_5(%arg0: i32) -> (i32, i32) {
    %c0_i32 = arith.constant 0 : i32
    %c0_i32_0 = arith.constant 0 : i32
    %c0_i32_1 = arith.constant 0 : i32
    return %c0_i32, %c0_i32_0 : i32, i32
  }
  func.func @transform_6(%arg0: i32) -> (i32, i32) {
    %c0_i32 = arith.constant 0 : i32
    %c0_i32_0 = arith.constant 0 : i32
    %c0_i32_1 = arith.constant 0 : i32
    return %c0_i32, %c0_i32_0 : i32, i32
  }
  func.func @transform_7(%arg0: i32) -> (i32, i32) {
    %c0_i32 = arith.constant 0 : i32
    %c0_i32_0 = arith.constant 0 : i32
    %c0_i32_1 = arith.constant 0 : i32
    return %c0_i32, %c0_i32_0 : i32, i32
  }
  func.func @transform_8(%arg0: i32) -> (i32, i32) {
    %c0_i32 = arith.constant 0 : i32
    %c0_i32_0 = arith.constant 0 : i32
    %c0_i32_1 = arith.constant 0 : i32
    return %c0_i32, %c0_i32_0 : i32, i32
  }
  func.func @transform_9(%arg0: i32) -> (i32, i32) {
    %c0_i32 = arith.constant 0 : i32
    %c0_i32_0 = arith.constant 0 : i32
    return %arg0, %c0_i32 : i32, i32
  }
}

</mosaic_0001>

<bundles_post_ra>
// kernel: soft_q_forward.1
= control target key start
LH: loop header
LB: loop body
LE: loop exit
PB: predicated region body
PF: predicated region fallthrough
CT: control target
= control target key end

     0   :  { %vm42_vm0 = vcmask 1043456   ;;  %vm38_vm1 = vcmask 31744   ;;  %vm66_vm2 = vcmask 130048   ;;  %vm104_vm3 = vcmask 261120   ;;  %s245_s2 = inlined_call_operand.vmem [shape: f32[16,32], index: 2, kind: input, shape index: {}]   ;;  %s246_s3 = inlined_call_operand.vmem [shape: f32[4,32], index: 3, kind: input, shape index: {}]   ;;  %s247_s1 = inlined_call_operand.vmem [shape: f32[8,4], index: 1, kind: input, shape index: {}]   ;;  %s248_s0 = inlined_call_operand.vmem [shape: f32[8,16], index: 0, kind: input, shape index: {}]   ;;  %s249_s4 = inlined_call_operand.vmem [shape: f32[1,32], index: 4, kind: input, shape index: {}]   ;;  %s250_s6 = inlined_call_operand.vmem [shape: f32[1,32], index: 6, kind: input, shape index: {}]   ;;  %s251_s5 = inlined_call_operand.vmem [shape: f32[32,32], index: 5, kind: input, shape index: {}]   ;;  %s252_s7 = inlined_call_operand.vmem [shape: f32[1,32], index: 7, kind: input, shape index: {}]   ;;  %s253_s8 = inlined_call_operand.<no memory space> [shape: f32[1,1], index: 8, kind: input, shape index: {}]   ;;  %s254_s9 = inlined_call_operand.vmem [shape: f32[8,1], index: 9, kind: output, shape index: {}]  }
   0x1   :  { %v35_v0 = vld [vmem:[%s245_s2 + $0x8] sm:$0xff]  ;;  %v37_v1 = vld [vmem:[%s246_s3] sm:$0xf]  ;;  %v99_v5 = vld [vmem:[%s251_s5 + $0x18] sm:$0xff]  ;;  %v138_v22 = vstv %s253_s8  ;;  %vm140_vm4 = vcmask 7168  }
   0x2   :  { %v34_v2 = vld [vmem:[%s245_s2] sm:$0xff]  ;;  %84 = vmatpush.msra.mxu1 %v35_v0  ;;  %146 = vmatpush.msk.msra.mxu0 %vm42_vm0, %v37_v1  ;;  %v98_v6 = vld [vmem:[%s251_s5 + $0x10] sm:$0xff]  ;;  %v97_v7 = vld [vmem:[%s251_s5 + $0x8] sm:$0xff] }
   0x3   :  { %v36_v3 = vld [vmem:[%s247_s1] sm:$0xff]  ;;  %120 = vmatpush.msra.mxu2 %v99_v5 }
   0x4   :  { %v33_v4 = vld [vmem:[%s248_s0] sm:$0xff]  ;;  %147 = vmatmul.msk.f32.vlgmr.msra.gmra.mxu0 %vm38_vm1, %v36_v3  ;;  %85 = vmatpush.msra.mxu1 %v34_v2 }
   0x5   :  { %148 = vmatmul.msk.f32.vlgmr.msra.gmra.mxu1 %vm66_vm2, %v33_v4  ;;  %121 = vmatpush.msra.mxu2 %v98_v6  ;;  %v96_v8 = vld [vmem:[%s251_s5] sm:$0xff] }
   0x6   :  { %v150_v10 = vld [vmem:[%s249_s4] ss:$0 sm:$0xff] }
   0x7   :  { %122 = vmatpush.msra.mxu2 %v97_v7  ;;  %v151_v15 = vld [vmem:[%s250_s6] ss:$0 sm:$0xff] }
   0x8   :  { %v152_v18 = vld [vmem:[%s252_s7] ss:$0 sm:$0xff] }
   0x9   :  { %123 = vmatpush.msra.mxu2 %v96_v8 }
  0x81   :  { %v63_v9 = vpop.f32.mrf.mxu0 }
  0x82   :  { %v87_v11 = vpop.f32.mrf.mxu1 }
  0x83   :  { %v88_v12 = vadd.f32 %v87_v11, %v63_v9 }
  0x85   :  { %v94_v13 = vadd.f32 %v150_v10, %v88_v12 }
  0x87   :  { %v95_v14 = vmax.f32 %v94_v13, 0.0 }
  0x89   :  { %149 = vmatmul.msk.f32.vlgmr.msra.gmra.mxu2 %vm104_vm3, %v95_v14 }
 0x10c   :  { %v125_v16 = vpop.f32.mrf.mxu2 }
 0x10d   :  { %v126_v17 = vadd.f32 %v151_v15, %v125_v16 }
 0x10f   :  { %v128_v19 = vmax.f32 %v126_v17, 0.0 }
 0x111   :  { %v133_v20 = vmul.f32 %v152_v18, %v128_v19 }
 0x113   :  { %v134_v21 = vsel %vm104_vm3, %v133_v20, 0.0 }
 0x114   :  { %135 = vadd.xlane.f32.xlu0 %v134_v21 }
 0x187   :  { %v136_v23 = vpop.xlane.xlu0 %135 }
 0x188   :  { %v139_v24 = vadd.f32 %v138_v22, %v136_v23 }
 0x18a   :  { %141 = vst.msk [vmem:[%s254_s9] sm:$0xff] %vm140_vm4, %v139_v24 }

</bundles_post_ra>
